<compile_context>
chip_gen: v7x
topology: tpu7x:2x2x1
jax: 0.10.0
libtpu: 0.0.40
codegen_flags: <defaults>
</compile_context>

<pallas_src>
import functools

import jax
import jax.numpy as jnp
from jax.experimental import pallas as pl
from jax.experimental.pallas import tpu as pltpu

# ----------------------------- config ---------------------------------------
B = 2             # batch
S = 16            # sequence length
EMBED = 128       # args.embed_size (lane-friendly multiple of 128)
VOCAB = 512       # len(dicts['w2ind']) + 2
DROPOUT_P = 0.2   # args.dropout


# ----------------------------- Pallas kernel --------------------------------
def _wordrep_kernel(ids_ref, tab_ref, mask_ref, out_ref, *, num_tokens, vocab):
    """Single grid step.

    ids_ref  : SMEM (T,)    int32  token ids (scalar prefetch)
    tab_ref  : VMEM (V, E)  f32    full embedding table, resident
    mask_ref : VMEM (T, E)  f32    pre-scaled dropout keep mask (0 or 1/(1-p))
    out_ref  : VMEM (T, E)  f32    output block (lane-dense, E multiple of 128)
    """
    # Embedding gather: one dynamic row load per token.  T is small and static,
    # so a fully static Python loop (static store offsets, dynamic load offset
    # from SMEM) is the cheapest, most robust form.
    for i in range(num_tokens):
        tok = ids_ref[i]
        idx = jnp.clip(tok, 0, vocab - 1)            # guard OOB ids (no HW check)
        row = tab_ref[pl.ds(idx, 1), :]              # (1, E) dynamic row load
        keep = (tok != 0).astype(row.dtype)          # padding_idx=0 -> zero row
        out_ref[pl.ds(i, 1), :] = row * keep

    # Fused nn.Dropout: one vectorized multiply over the whole output block.
    out_ref[...] = out_ref[...] * mask_ref[...]


# ----------------------------- wrapper ---------------------------------------
def wordrep_forward(embed_table, x, target=None, text_inputs=None, *,
                    rng_key=None, dropout_p=DROPOUT_P, training=True):
    """WordRep.forward(x, target, text_inputs) -> (B, S, feature_size).

    `target` is unused by WordRep.forward; `text_inputs` is only consumed by
    the ELMo branch.
    """
    # TODO(synk): ELMo branch (use_elmo=True: pretrained biLM + concat on dim=2)
    # has no clean Pallas equivalent; only the embedding path is implemented.
    del target, text_inputs

    Bn, Sn = x.shape
    V, E = embed_table.shape
    T = Bn * Sn
    assert E % 128 == 0, "embed dim must be lane-dense (multiple of 128)"
    assert T % 8 == 0, "token count must be a multiple of 8 sublanes"

    ids = x.reshape(T).astype(jnp.int32)

    # Dropout keep-mask, pre-scaled by 1/(1-p) (train) or all-ones (eval).
    if training and dropout_p > 0.0:
        if rng_key is None:
            rng_key = jax.random.PRNGKey(0)
        keep = jax.random.bernoulli(rng_key, 1.0 - dropout_p, (T, E))
        mask = keep.astype(jnp.float32) * (1.0 / (1.0 - dropout_p))
    else:
        mask = jnp.ones((T, E), jnp.float32)

    kern = functools.partial(_wordrep_kernel, num_tokens=T, vocab=V)

    out = pl.pallas_call(
        kern,
        out_shape=jax.ShapeDtypeStruct((T, E), jnp.float32),
        grid_spec=pltpu.PrefetchScalarGridSpec(
            num_scalar_prefetch=1,                       # token ids -> SMEM
            grid=(1,),                                   # single step: table is tiny
            in_specs=[
                pl.BlockSpec((V, E), lambda i, ids: (0, 0)),   # whole table in VMEM
                pl.BlockSpec((T, E), lambda i, ids: (0, 0)),   # dropout keep mask
            ],
            out_specs=pl.BlockSpec((T, E), lambda i, ids: (0, 0)),
        ),
        compiler_params=pltpu.CompilerParams(
            dimension_semantics=("arbitrary",)),
    )(ids, embed_table, mask)

    return out.reshape(Bn, Sn, E)


# ----------------------------- main ------------------------------------------
if __name__ == "__main__":
    key = jax.random.PRNGKey(0)
    k_w, k_x, k_t, k_d = jax.random.split(key, 4)

    # nn.Embedding default init, with the padding_idx=0 row zeroed.
    embed_table = jax.random.normal(k_w, (VOCAB, EMBED), jnp.float32)
    embed_table = embed_table.at[0].set(0.0)

    x = jax.random.randint(k_x, (B, S), 0, VOCAB, dtype=jnp.int32)
    target = jax.random.bernoulli(k_t, 0.5, (B, 50)).astype(jnp.float32)  # unused
    text_inputs = None                                                    # unused (use_elmo=False)

    # Eval-mode pass (no dropout) — exact parity with table[x].
    fwd_eval = jax.jit(functools.partial(wordrep_forward,
                                         dropout_p=DROPOUT_P, training=False))
    out_eval = fwd_eval(embed_table, x, target, text_inputs)
    jax.block_until_ready(out_eval)
    ref_eval = embed_table[x.reshape(-1)].reshape(B, S, EMBED)
    assert out_eval.shape == (B, S, EMBED) and out_eval.dtype == jnp.float32
    assert jnp.allclose(out_eval, ref_eval), "embedding gather mismatch"

    # Train-mode pass (fused dropout).
    fwd_train = jax.jit(functools.partial(wordrep_forward,
                                          dropout_p=DROPOUT_P, training=True))
    out_train = fwd_train(embed_table, x, target, text_inputs, rng_key=k_d)
    jax.block_until_ready(out_train)
    assert out_train.shape == (B, S, EMBED) and out_train.dtype == jnp.float32

    print("KERNEL_OK")
</pallas_src>

<mosaic_0001>
module attributes {stable_mosaic.version = 11 : i64} {
  func.func @_wordrep_kernel(%arg0: i32, %arg1: memref<32xi32, #tpu.memory_space<smem>>, %arg2: memref<512x128xf32, #tpu.memory_space<vmem>>, %arg3: memref<32x128xf32, #tpu.memory_space<vmem>>, %arg4: memref<32x128xf32, #tpu.memory_space<vmem>>) attributes {dimension_semantics = [#tpu.dimension_semantics<arbitrary>], iteration_bounds = array<i64: 1>, scalar_prefetch = 1 : i64, scratch_operands = 0 : i64, tpu.core_type = #tpu.core_type<tc>, window_params = [{pipeline_mode = #tpu.pipeline_mode<synchronous>, transform_indices = @transform_0, window_bounds = array<i64: 512, 128>}, {pipeline_mode = #tpu.pipeline_mode<synchronous>, transform_indices = @transform_1, window_bounds = array<i64: 32, 128>}, {pipeline_mode = #tpu.pipeline_mode<synchronous>, transform_indices = @transform_2, window_bounds = array<i64: 32, 128>}]} {
    %c0 = arith.constant 0 : index
    %0 = memref.load %arg1[%c0] : memref<32xi32, #tpu.memory_space<smem>>
    %c0_i32 = arith.constant 0 : i32
    %c511_i32 = arith.constant 511 : i32
    %1 = arith.maxsi %c0_i32, %0 : i32
    %2 = arith.minsi %c511_i32, %1 : i32
    %3 = arith.index_cast %2 : i32 to index
    %c0_0 = arith.constant 0 : index
    %4 = vector.load %arg2[%3, %c0_0] : memref<512x128xf32, #tpu.memory_space<vmem>>, vector<1x128xf32>
    %c0_i32_1 = arith.constant 0 : i32
    %5 = arith.cmpi ne, %0, %c0_i32_1 : i32
    %6 = arith.extui %5 : i1 to i32
    %7 = arith.sitofp %6 : i32 to f32
    %8 = vector.broadcast %7 : f32 to vector<1x128xf32>
    %9 = arith.mulf %4, %8 : vector<1x128xf32>
    %c0_2 = arith.constant 0 : index
    %c0_3 = arith.constant 0 : index
    %10 = vector.load %arg4[%c0_2, %c0_3] : memref<32x128xf32, #tpu.memory_space<vmem>>, vector<1x128xf32>
    tpu.vector_store %arg4[%c0_2, %c0_3], %9 {strides = array<i32>} : memref<32x128xf32, #tpu.memory_space<vmem>>, vector<1x128xf32>,
    %c1 = arith.constant 1 : index
    %11 = memref.load %arg1[%c1] : memref<32xi32, #tpu.memory_space<smem>>
    %c0_i32_4 = arith.constant 0 : i32
    %c511_i32_5 = arith.constant 511 : i32
    %12 = arith.maxsi %c0_i32_4, %11 : i32
    %13 = arith.minsi %c511_i32_5, %12 : i32
    %14 = arith.index_cast %13 : i32 to index
    %c0_6 = arith.constant 0 : index
    %15 = vector.load %arg2[%14, %c0_6] : memref<512x128xf32, #tpu.memory_space<vmem>>, vector<1x128xf32>
    %c0_i32_7 = arith.constant 0 : i32
    %16 = arith.cmpi ne, %11, %c0_i32_7 : i32
    %17 = arith.extui %16 : i1 to i32
    %18 = arith.sitofp %17 : i32 to f32
    %19 = vector.broadcast %18 : f32 to vector<1x128xf32>
    %20 = arith.mulf %15, %19 : vector<1x128xf32>
    %c1_8 = arith.constant 1 : index
    %c0_9 = arith.constant 0 : index
    %21 = vector.load %arg4[%c1_8, %c0_9] : memref<32x128xf32, #tpu.memory_space<vmem>>, vector<1x128xf32>
    tpu.vector_store %arg4[%c1_8, %c0_9], %20 {strides = array<i32>} : memref<32x128xf32, #tpu.memory_space<vmem>>, vector<1x128xf32>,
    %c2 = arith.constant 2 : index
    %22 = memref.load %arg1[%c2] : memref<32xi32, #tpu.memory_space<smem>>
    %c0_i32_10 = arith.constant 0 : i32
    %c511_i32_11 = arith.constant 511 : i32
    %23 = arith.maxsi %c0_i32_10, %22 : i32
    %24 = arith.minsi %c511_i32_11, %23 : i32
    %25 = arith.index_cast %24 : i32 to index
    %c0_12 = arith.constant 0 : index
    %26 = vector.load %arg2[%25, %c0_12] : memref<512x128xf32, #tpu.memory_space<vmem>>, vector<1x128xf32>
    %c0_i32_13 = arith.constant 0 : i32
    %27 = arith.cmpi ne, %22, %c0_i32_13 : i32
    %28 = arith.extui %27 : i1 to i32
    %29 = arith.sitofp %28 : i32 to f32
    %30 = vector.broadcast %29 : f32 to vector<1x128xf32>
    %31 = arith.mulf %26, %30 : vector<1x128xf32>
    %c2_14 = arith.constant 2 : index
    %c0_15 = arith.constant 0 : index
    %32 = vector.load %arg4[%c2_14, %c0_15] : memref<32x128xf32, #tpu.memory_space<vmem>>, vector<1x128xf32>
    tpu.vector_store %arg4[%c2_14, %c0_15], %31 {strides = array<i32>} : memref<32x128xf32, #tpu.memory_space<vmem>>, vector<1x128xf32>,
    %c3 = arith.constant 3 : index
    %33 = memref.load %arg1[%c3] : memref<32xi32, #tpu.memory_space<smem>>
    %c0_i32_16 = arith.constant 0 : i32
    %c511_i32_17 = arith.constant 511 : i32
    %34 = arith.maxsi %c0_i32_16, %33 : i32
    %35 = arith.minsi %c511_i32_17, %34 : i32
    %36 = arith.index_cast %35 : i32 to index
    %c0_18 = arith.constant 0 : index
    %37 = vector.load %arg2[%36, %c0_18] : memref<512x128xf32, #tpu.memory_space<vmem>>, vector<1x128xf32>
    %c0_i32_19 = arith.constant 0 : i32
    %38 = arith.cmpi ne, %33, %c0_i32_19 : i32
    %39 = arith.extui %38 : i1 to i32
    %40 = arith.sitofp %39 : i32 to f32
    %41 = vector.broadcast %40 : f32 to vector<1x128xf32>
    %42 = arith.mulf %37, %41 : vector<1x128xf32>
    %c3_20 = arith.constant 3 : index
    %c0_21 = arith.constant 0 : index
    %43 = vector.load %arg4[%c3_20, %c0_21] : memref<32x128xf32, #tpu.memory_space<vmem>>, vector<1x128xf32>
    tpu.vector_store %arg4[%c3_20, %c0_21], %42 {strides = array<i32>} : memref<32x128xf32, #tpu.memory_space<vmem>>, vector<1x128xf32>,
    %c4 = arith.constant 4 : index
    %44 = memref.load %arg1[%c4] : memref<32xi32, #tpu.memory_space<smem>>
    %c0_i32_22 = arith.constant 0 : i32
    %c511_i32_23 = arith.constant 511 : i32
    %45 = arith.maxsi %c0_i32_22, %44 : i32
    %46 = arith.minsi %c511_i32_23, %45 : i32
    %47 = arith.index_cast %46 : i32 to index
    %c0_24 = arith.constant 0 : index
    %48 = vector.load %arg2[%47, %c0_24] : memref<512x128xf32, #tpu.memory_space<vmem>>, vector<1x128xf32>
    %c0_i32_25 = arith.constant 0 : i32
    %49 = arith.cmpi ne, %44, %c0_i32_25 : i32
    %50 = arith.extui %49 : i1 to i32
    %51 = arith.sitofp %50 : i32 to f32
    %52 = vector.broadcast %51 : f32 to vector<1x128xf32>
    %53 = arith.mulf %48, %52 : vector<1x128xf32>
    %c4_26 = arith.constant 4 : index
    %c0_27 = arith.constant 0 : index
    %54 = vector.load %arg4[%c4_26, %c0_27] : memref<32x128xf32, #tpu.memory_space<vmem>>, vector<1x128xf32>
    tpu.vector_store %arg4[%c4_26, %c0_27], %53 {strides = array<i32>} : memref<32x128xf32, #tpu.memory_space<vmem>>, vector<1x128xf32>,
    %c5 = arith.constant 5 : index
    %55 = memref.load %arg1[%c5] : memref<32xi32, #tpu.memory_space<smem>>
    %c0_i32_28 = arith.constant 0 : i32
    %c511_i32_29 = arith.constant 511 : i32
    %56 = arith.maxsi %c0_i32_28, %55 : i32
    %57 = arith.minsi %c511_i32_29, %56 : i32
    %58 = arith.index_cast %57 : i32 to index
    %c0_30 = arith.constant 0 : index
    %59 = vector.load %arg2[%58, %c0_30] : memref<512x128xf32, #tpu.memory_space<vmem>>, vector<1x128xf32>
    %c0_i32_31 = arith.constant 0 : i32
    %60 = arith.cmpi ne, %55, %c0_i32_31 : i32
    %61 = arith.extui %60 : i1 to i32
    %62 = arith.sitofp %61 : i32 to f32
    %63 = vector.broadcast %62 : f32 to vector<1x128xf32>
    %64 = arith.mulf %59, %63 : vector<1x128xf32>
    %c5_32 = arith.constant 5 : index
    %c0_33 = arith.constant 0 : index
    %65 = vector.load %arg4[%c5_32, %c0_33] : memref<32x128xf32, #tpu.memory_space<vmem>>, vector<1x128xf32>
    tpu.vector_store %arg4[%c5_32, %c0_33], %64 {strides = array<i32>} : memref<32x128xf32, #tpu.memory_space<vmem>>, vector<1x128xf32>,
    %c6 = arith.constant 6 : index
    %66 = memref.load %arg1[%c6] : memref<32xi32, #tpu.memory_space<smem>>
    %c0_i32_34 = arith.constant 0 : i32
    %c511_i32_35 = arith.constant 511 : i32
    %67 = arith.maxsi %c0_i32_34, %66 : i32
    %68 = arith.minsi %c511_i32_35, %67 : i32
    %69 = arith.index_cast %68 : i32 to index
    %c0_36 = arith.constant 0 : index
    %70 = vector.load %arg2[%69, %c0_36] : memref<512x128xf32, #tpu.memory_space<vmem>>, vector<1x128xf32>
    %c0_i32_37 = arith.constant 0 : i32
    %71 = arith.cmpi ne, %66, %c0_i32_37 : i32
    %72 = arith.extui %71 : i1 to i32
    %73 = arith.sitofp %72 : i32 to f32
    %74 = vector.broadcast %73 : f32 to vector<1x128xf32>
    %75 = arith.mulf %70, %74 : vector<1x128xf32>
    %c6_38 = arith.constant 6 : index
    %c0_39 = arith.constant 0 : index
    %76 = vector.load %arg4[%c6_38, %c0_39] : memref<32x128xf32, #tpu.memory_space<vmem>>, vector<1x128xf32>
    tpu.vector_store %arg4[%c6_38, %c0_39], %75 {strides = array<i32>} : memref<32x128xf32, #tpu.memory_space<vmem>>, vector<1x128xf32>,
    %c7 = arith.constant 7 : index
    %77 = memref.load %arg1[%c7] : memref<32xi32, #tpu.memory_space<smem>>
    %c0_i32_40 = arith.constant 0 : i32
    %c511_i32_41 = arith.constant 511 : i32
    %78 = arith.maxsi %c0_i32_40, %77 : i32
    %79 = arith.minsi %c511_i32_41, %78 : i32
    %80 = arith.index_cast %79 : i32 to index
    %c0_42 = arith.constant 0 : index
    %81 = vector.load %arg2[%80, %c0_42] : memref<512x128xf32, #tpu.memory_space<vmem>>, vector<1x128xf32>
    %c0_i32_43 = arith.constant 0 : i32
    %82 = arith.cmpi ne, %77, %c0_i32_43 : i32
    %83 = arith.extui %82 : i1 to i32
    %84 = arith.sitofp %83 : i32 to f32
    %85 = vector.broadcast %84 : f32 to vector<1x128xf32>
    %86 = arith.mulf %81, %85 : vector<1x128xf32>
    %c7_44 = arith.constant 7 : index
    %c0_45 = arith.constant 0 : index
    %87 = vector.load %arg4[%c7_44, %c0_45] : memref<32x128xf32, #tpu.memory_space<vmem>>, vector<1x128xf32>
    tpu.vector_store %arg4[%c7_44, %c0_45], %86 {strides = array<i32>} : memref<32x128xf32, #tpu.memory_space<vmem>>, vector<1x128xf32>,
    %c8 = arith.constant 8 : index
    %88 = memref.load %arg1[%c8] : memref<32xi32, #tpu.memory_space<smem>>
    %c0_i32_46 = arith.constant 0 : i32
    %c511_i32_47 = arith.constant 511 : i32
    %89 = arith.maxsi %c0_i32_46, %88 : i32
    %90 = arith.minsi %c511_i32_47, %89 : i32
    %91 = arith.index_cast %90 : i32 to index
    %c0_48 = arith.constant 0 : index
    %92 = vector.load %arg2[%91, %c0_48] : memref<512x128xf32, #tpu.memory_space<vmem>>, vector<1x128xf32>
    %c0_i32_49 = arith.constant 0 : i32
    %93 = arith.cmpi ne, %88, %c0_i32_49 : i32
    %94 = arith.extui %93 : i1 to i32
    %95 = arith.sitofp %94 : i32 to f32
    %96 = vector.broadcast %95 : f32 to vector<1x128xf32>
    %97 = arith.mulf %92, %96 : vector<1x128xf32>
    %c8_50 = arith.constant 8 : index
    %c0_51 = arith.constant 0 : index
    %98 = vector.load %arg4[%c8_50, %c0_51] : memref<32x128xf32, #tpu.memory_space<vmem>>, vector<1x128xf32>
    tpu.vector_store %arg4[%c8_50, %c0_51], %97 {strides = array<i32>} : memref<32x128xf32, #tpu.memory_space<vmem>>, vector<1x128xf32>,
    %c9 = arith.constant 9 : index
    %99 = memref.load %arg1[%c9] : memref<32xi32, #tpu.memory_space<smem>>
    %c0_i32_52 = arith.constant 0 : i32
    %c511_i32_53 = arith.constant 511 : i32
    %100 = arith.maxsi %c0_i32_52, %99 : i32
    %101 = arith.minsi %c511_i32_53, %100 : i32
    %102 = arith.index_cast %101 : i32 to index
    %c0_54 = arith.constant 0 : index
    %103 = vector.load %arg2[%102, %c0_54] : memref<512x128xf32, #tpu.memory_space<vmem>>, vector<1x128xf32>
    %c0_i32_55 = arith.constant 0 : i32
    %104 = arith.cmpi ne, %99, %c0_i32_55 : i32
    %105 = arith.extui %104 : i1 to i32
    %106 = arith.sitofp %105 : i32 to f32
    %107 = vector.broadcast %106 : f32 to vector<1x128xf32>
    %108 = arith.mulf %103, %107 : vector<1x128xf32>
    %c9_56 = arith.constant 9 : index
    %c0_57 = arith.constant 0 : index
    %109 = vector.load %arg4[%c9_56, %c0_57] : memref<32x128xf32, #tpu.memory_space<vmem>>, vector<1x128xf32>
    tpu.vector_store %arg4[%c9_56, %c0_57], %108 {strides = array<i32>} : memref<32x128xf32, #tpu.memory_space<vmem>>, vector<1x128xf32>,
    %c10 = arith.constant 10 : index
    %110 = memref.load %arg1[%c10] : memref<32xi32, #tpu.memory_space<smem>>
    %c0_i32_58 = arith.constant 0 : i32
    %c511_i32_59 = arith.constant 511 : i32
    %111 = arith.maxsi %c0_i32_58, %110 : i32
    %112 = arith.minsi %c511_i32_59, %111 : i32
    %113 = arith.index_cast %112 : i32 to index
    %c0_60 = arith.constant 0 : index
    %114 = vector.load %arg2[%113, %c0_60] : memref<512x128xf32, #tpu.memory_space<vmem>>, vector<1x128xf32>
    %c0_i32_61 = arith.constant 0 : i32
    %115 = arith.cmpi ne, %110, %c0_i32_61 : i32
    %116 = arith.extui %115 : i1 to i32
    %117 = arith.sitofp %116 : i32 to f32
    %118 = vector.broadcast %117 : f32 to vector<1x128xf32>
    %119 = arith.mulf %114, %118 : vector<1x128xf32>
    %c10_62 = arith.constant 10 : index
    %c0_63 = arith.constant 0 : index
    %120 = vector.load %arg4[%c10_62, %c0_63] : memref<32x128xf32, #tpu.memory_space<vmem>>, vector<1x128xf32>
    tpu.vector_store %arg4[%c10_62, %c0_63], %119 {strides = array<i32>} : memref<32x128xf32, #tpu.memory_space<vmem>>, vector<1x128xf32>,
    %c11 = arith.constant 11 : index
    %121 = memref.load %arg1[%c11] : memref<32xi32, #tpu.memory_space<smem>>
    %c0_i32_64 = arith.constant 0 : i32
    %c511_i32_65 = arith.constant 511 : i32
    %122 = arith.maxsi %c0_i32_64, %121 : i32
    %123 = arith.minsi %c511_i32_65, %122 : i32
    %124 = arith.index_cast %123 : i32 to index
    %c0_66 = arith.constant 0 : index
    %125 = vector.load %arg2[%124, %c0_66] : memref<512x128xf32, #tpu.memory_space<vmem>>, vector<1x128xf32>
    %c0_i32_67 = arith.constant 0 : i32
    %126 = arith.cmpi ne, %121, %c0_i32_67 : i32
    %127 = arith.extui %126 : i1 to i32
    %128 = arith.sitofp %127 : i32 to f32
    %129 = vector.broadcast %128 : f32 to vector<1x128xf32>
    %130 = arith.mulf %125, %129 : vector<1x128xf32>
    %c11_68 = arith.constant 11 : index
    %c0_69 = arith.constant 0 : index
    %131 = vector.load %arg4[%c11_68, %c0_69] : memref<32x128xf32, #tpu.memory_space<vmem>>, vector<1x128xf32>
    tpu.vector_store %arg4[%c11_68, %c0_69], %130 {strides = array<i32>} : memref<32x128xf32, #tpu.memory_space<vmem>>, vector<1x128xf32>,
    %c12 = arith.constant 12 : index
    %132 = memref.load %arg1[%c12] : memref<32xi32, #tpu.memory_space<smem>>
    %c0_i32_70 = arith.constant 0 : i32
    %c511_i32_71 = arith.constant 511 : i32
    %133 = arith.maxsi %c0_i32_70, %132 : i32
    %134 = arith.minsi %c511_i32_71, %133 : i32
    %135 = arith.index_cast %134 : i32 to index
    %c0_72 = arith.constant 0 : index
    %136 = vector.load %arg2[%135, %c0_72] : memref<512x128xf32, #tpu.memory_space<vmem>>, vector<1x128xf32>
    %c0_i32_73 = arith.constant 0 : i32
    %137 = arith.cmpi ne, %132, %c0_i32_73 : i32
    %138 = arith.extui %137 : i1 to i32
    %139 = arith.sitofp %138 : i32 to f32
    %140 = vector.broadcast %139 : f32 to vector<1x128xf32>
    %141 = arith.mulf %136, %140 : vector<1x128xf32>
    %c12_74 = arith.constant 12 : index
    %c0_75 = arith.constant 0 : index
    %142 = vector.load %arg4[%c12_74, %c0_75] : memref<32x128xf32, #tpu.memory_space<vmem>>, vector<1x128xf32>
    tpu.vector_store %arg4[%c12_74, %c0_75], %141 {strides = array<i32>} : memref<32x128xf32, #tpu.memory_space<vmem>>, vector<1x128xf32>,
    %c13 = arith.constant 13 : index
    %143 = memref.load %arg1[%c13] : memref<32xi32, #tpu.memory_space<smem>>
    %c0_i32_76 = arith.constant 0 : i32
    %c511_i32_77 = arith.constant 511 : i32
    %144 = arith.maxsi %c0_i32_76, %143 : i32
    %145 = arith.minsi %c511_i32_77, %144 : i32
    %146 = arith.index_cast %145 : i32 to index
    %c0_78 = arith.constant 0 : index
    %147 = vector.load %arg2[%146, %c0_78] : memref<512x128xf32, #tpu.memory_space<vmem>>, vector<1x128xf32>
    %c0_i32_79 = arith.constant 0 : i32
    %148 = arith.cmpi ne, %143, %c0_i32_79 : i32
    %149 = arith.extui %148 : i1 to i32
    %150 = arith.sitofp %149 : i32 to f32
    %151 = vector.broadcast %150 : f32 to vector<1x128xf32>
    %152 = arith.mulf %147, %151 : vector<1x128xf32>
    %c13_80 = arith.constant 13 : index
    %c0_81 = arith.constant 0 : index
    %153 = vector.load %arg4[%c13_80, %c0_81] : memref<32x128xf32, #tpu.memory_space<vmem>>, vector<1x128xf32>
    tpu.vector_store %arg4[%c13_80, %c0_81], %152 {strides = array<i32>} : memref<32x128xf32, #tpu.memory_space<vmem>>, vector<1x128xf32>,
    %c14 = arith.constant 14 : index
    %154 = memref.load %arg1[%c14] : memref<32xi32, #tpu.memory_space<smem>>
    %c0_i32_82 = arith.constant 0 : i32
    %c511_i32_83 = arith.constant 511 : i32
    %155 = arith.maxsi %c0_i32_82, %154 : i32
    %156 = arith.minsi %c511_i32_83, %155 : i32
    %157 = arith.index_cast %156 : i32 to index
    %c0_84 = arith.constant 0 : index
    %158 = vector.load %arg2[%157, %c0_84] : memref<512x128xf32, #tpu.memory_space<vmem>>, vector<1x128xf32>
    %c0_i32_85 = arith.constant 0 : i32
    %159 = arith.cmpi ne, %154, %c0_i32_85 : i32
    %160 = arith.extui %159 : i1 to i32
    %161 = arith.sitofp %160 : i32 to f32
    %162 = vector.broadcast %161 : f32 to vector<1x128xf32>
    %163 = arith.mulf %158, %162 : vector<1x128xf32>
    %c14_86 = arith.constant 14 : index
    %c0_87 = arith.constant 0 : index
    %164 = vector.load %arg4[%c14_86, %c0_87] : memref<32x128xf32, #tpu.memory_space<vmem>>, vector<1x128xf32>
    tpu.vector_store %arg4[%c14_86, %c0_87], %163 {strides = array<i32>} : memref<32x128xf32, #tpu.memory_space<vmem>>, vector<1x128xf32>,
    %c15 = arith.constant 15 : index
    %165 = memref.load %arg1[%c15] : memref<32xi32, #tpu.memory_space<smem>>
    %c0_i32_88 = arith.constant 0 : i32
    %c511_i32_89 = arith.constant 511 : i32
    %166 = arith.maxsi %c0_i32_88, %165 : i32
    %167 = arith.minsi %c511_i32_89, %166 : i32
    %168 = arith.index_cast %167 : i32 to index
    %c0_90 = arith.constant 0 : index
    %169 = vector.load %arg2[%168, %c0_90] : memref<512x128xf32, #tpu.memory_space<vmem>>, vector<1x128xf32>
    %c0_i32_91 = arith.constant 0 : i32
    %170 = arith.cmpi ne, %165, %c0_i32_91 : i32
    %171 = arith.extui %170 : i1 to i32
    %172 = arith.sitofp %171 : i32 to f32
    %173 = vector.broadcast %172 : f32 to vector<1x128xf32>
    %174 = arith.mulf %169, %173 : vector<1x128xf32>
    %c15_92 = arith.constant 15 : index
    %c0_93 = arith.constant 0 : index
    %175 = vector.load %arg4[%c15_92, %c0_93] : memref<32x128xf32, #tpu.memory_space<vmem>>, vector<1x128xf32>
    tpu.vector_store %arg4[%c15_92, %c0_93], %174 {strides = array<i32>} : memref<32x128xf32, #tpu.memory_space<vmem>>, vector<1x128xf32>,
    %c16 = arith.constant 16 : index
    %176 = memref.load %arg1[%c16] : memref<32xi32, #tpu.memory_space<smem>>
    %c0_i32_94 = arith.constant 0 : i32
    %c511_i32_95 = arith.constant 511 : i32
    %177 = arith.maxsi %c0_i32_94, %176 : i32
    %178 = arith.minsi %c511_i32_95, %177 : i32
    %179 = arith.index_cast %178 : i32 to index
    %c0_96 = arith.constant 0 : index
    %180 = vector.load %arg2[%179, %c0_96] : memref<512x128xf32, #tpu.memory_space<vmem>>, vector<1x128xf32>
    %c0_i32_97 = arith.constant 0 : i32
    %181 = arith.cmpi ne, %176, %c0_i32_97 : i32
    %182 = arith.extui %181 : i1 to i32
    %183 = arith.sitofp %182 : i32 to f32
    %184 = vector.broadcast %183 : f32 to vector<1x128xf32>
    %185 = arith.mulf %180, %184 : vector<1x128xf32>
    %c16_98 = arith.constant 16 : index
    %c0_99 = arith.constant 0 : index
    %186 = vector.load %arg4[%c16_98, %c0_99] : memref<32x128xf32, #tpu.memory_space<vmem>>, vector<1x128xf32>
    tpu.vector_store %arg4[%c16_98, %c0_99], %185 {strides = array<i32>} : memref<32x128xf32, #tpu.memory_space<vmem>>, vector<1x128xf32>,
    %c17 = arith.constant 17 : index
    %187 = memref.load %arg1[%c17] : memref<32xi32, #tpu.memory_space<smem>>
    %c0_i32_100 = arith.constant 0 : i32
    %c511_i32_101 = arith.constant 511 : i32
    %188 = arith.maxsi %c0_i32_100, %187 : i32
    %189 = arith.minsi %c511_i32_101, %188 : i32
    %190 = arith.index_cast %189 : i32 to index
    %c0_102 = arith.constant 0 : index
    %191 = vector.load %arg2[%190, %c0_102] : memref<512x128xf32, #tpu.memory_space<vmem>>, vector<1x128xf32>
    %c0_i32_103 = arith.constant 0 : i32
    %192 = arith.cmpi ne, %187, %c0_i32_103 : i32
    %193 = arith.extui %192 : i1 to i32
    %194 = arith.sitofp %193 : i32 to f32
    %195 = vector.broadcast %194 : f32 to vector<1x128xf32>
    %196 = arith.mulf %191, %195 : vector<1x128xf32>
    %c17_104 = arith.constant 17 : index
    %c0_105 = arith.constant 0 : index
    %197 = vector.load %arg4[%c17_104, %c0_105] : memref<32x128xf32, #tpu.memory_space<vmem>>, vector<1x128xf32>
    tpu.vector_store %arg4[%c17_104, %c0_105], %196 {strides = array<i32>} : memref<32x128xf32, #tpu.memory_space<vmem>>, vector<1x128xf32>,
    %c18 = arith.constant 18 : index
    %198 = memref.load %arg1[%c18] : memref<32xi32, #tpu.memory_space<smem>>
    %c0_i32_106 = arith.constant 0 : i32
    %c511_i32_107 = arith.constant 511 : i32
    %199 = arith.maxsi %c0_i32_106, %198 : i32
    %200 = arith.minsi %c511_i32_107, %199 : i32
    %201 = arith.index_cast %200 : i32 to index
    %c0_108 = arith.constant 0 : index
    %202 = vector.load %arg2[%201, %c0_108] : memref<512x128xf32, #tpu.memory_space<vmem>>, vector<1x128xf32>
    %c0_i32_109 = arith.constant 0 : i32
    %203 = arith.cmpi ne, %198, %c0_i32_109 : i32
    %204 = arith.extui %203 : i1 to i32
    %205 = arith.sitofp %204 : i32 to f32
    %206 = vector.broadcast %205 : f32 to vector<1x128xf32>
    %207 = arith.mulf %202, %206 : vector<1x128xf32>
    %c18_110 = arith.constant 18 : index
    %c0_111 = arith.constant 0 : index
    %208 = vector.load %arg4[%c18_110, %c0_111] : memref<32x128xf32, #tpu.memory_space<vmem>>, vector<1x128xf32>
    tpu.vector_store %arg4[%c18_110, %c0_111], %207 {strides = array<i32>} : memref<32x128xf32, #tpu.memory_space<vmem>>, vector<1x128xf32>,
    %c19 = arith.constant 19 : index
    %209 = memref.load %arg1[%c19] : memref<32xi32, #tpu.memory_space<smem>>
    %c0_i32_112 = arith.constant 0 : i32
    %c511_i32_113 = arith.constant 511 : i32
    %210 = arith.maxsi %c0_i32_112, %209 : i32
    %211 = arith.minsi %c511_i32_113, %210 : i32
    %212 = arith.index_cast %211 : i32 to index
    %c0_114 = arith.constant 0 : index
    %213 = vector.load %arg2[%212, %c0_114] : memref<512x128xf32, #tpu.memory_space<vmem>>, vector<1x128xf32>
    %c0_i32_115 = arith.constant 0 : i32
    %214 = arith.cmpi ne, %209, %c0_i32_115 : i32
    %215 = arith.extui %214 : i1 to i32
    %216 = arith.sitofp %215 : i32 to f32
    %217 = vector.broadcast %216 : f32 to vector<1x128xf32>
    %218 = arith.mulf %213, %217 : vector<1x128xf32>
    %c19_116 = arith.constant 19 : index
    %c0_117 = arith.constant 0 : index
    %219 = vector.load %arg4[%c19_116, %c0_117] : memref<32x128xf32, #tpu.memory_space<vmem>>, vector<1x128xf32>
    tpu.vector_store %arg4[%c19_116, %c0_117], %218 {strides = array<i32>} : memref<32x128xf32, #tpu.memory_space<vmem>>, vector<1x128xf32>,
    %c20 = arith.constant 20 : index
    %220 = memref.load %arg1[%c20] : memref<32xi32, #tpu.memory_space<smem>>
    %c0_i32_118 = arith.constant 0 : i32
    %c511_i32_119 = arith.constant 511 : i32
    %221 = arith.maxsi %c0_i32_118, %220 : i32
    %222 = arith.minsi %c511_i32_119, %221 : i32
    %223 = arith.index_cast %222 : i32 to index
    %c0_120 = arith.constant 0 : index
    %224 = vector.load %arg2[%223, %c0_120] : memref<512x128xf32, #tpu.memory_space<vmem>>, vector<1x128xf32>
    %c0_i32_121 = arith.constant 0 : i32
    %225 = arith.cmpi ne, %220, %c0_i32_121 : i32
    %226 = arith.extui %225 : i1 to i32
    %227 = arith.sitofp %226 : i32 to f32
    %228 = vector.broadcast %227 : f32 to vector<1x128xf32>
    %229 = arith.mulf %224, %228 : vector<1x128xf32>
    %c20_122 = arith.constant 20 : index
    %c0_123 = arith.constant 0 : index
    %230 = vector.load %arg4[%c20_122, %c0_123] : memref<32x128xf32, #tpu.memory_space<vmem>>, vector<1x128xf32>
    tpu.vector_store %arg4[%c20_122, %c0_123], %229 {strides = array<i32>} : memref<32x128xf32, #tpu.memory_space<vmem>>, vector<1x128xf32>,
    %c21 = arith.constant 21 : index
    %231 = memref.load %arg1[%c21] : memref<32xi32, #tpu.memory_space<smem>>
    %c0_i32_124 = arith.constant 0 : i32
    %c511_i32_125 = arith.constant 511 : i32
    %232 = arith.maxsi %c0_i32_124, %231 : i32
    %233 = arith.minsi %c511_i32_125, %232 : i32
    %234 = arith.index_cast %233 : i32 to index
    %c0_126 = arith.constant 0 : index
    %235 = vector.load %arg2[%234, %c0_126] : memref<512x128xf32, #tpu.memory_space<vmem>>, vector<1x128xf32>
    %c0_i32_127 = arith.constant 0 : i32
    %236 = arith.cmpi ne, %231, %c0_i32_127 : i32
    %237 = arith.extui %236 : i1 to i32
    %238 = arith.sitofp %237 : i32 to f32
    %239 = vector.broadcast %238 : f32 to vector<1x128xf32>
    %240 = arith.mulf %235, %239 : vector<1x128xf32>
    %c21_128 = arith.constant 21 : index
    %c0_129 = arith.constant 0 : index
    %241 = vector.load %arg4[%c21_128, %c0_129] : memref<32x128xf32, #tpu.memory_space<vmem>>, vector<1x128xf32>
    tpu.vector_store %arg4[%c21_128, %c0_129], %240 {strides = array<i32>} : memref<32x128xf32, #tpu.memory_space<vmem>>, vector<1x128xf32>,
    %c22 = arith.constant 22 : index
    %242 = memref.load %arg1[%c22] : memref<32xi32, #tpu.memory_space<smem>>
    %c0_i32_130 = arith.constant 0 : i32
    %c511_i32_131 = arith.constant 511 : i32
    %243 = arith.maxsi %c0_i32_130, %242 : i32
    %244 = arith.minsi %c511_i32_131, %243 : i32
    %245 = arith.index_cast %244 : i32 to index
    %c0_132 = arith.constant 0 : index
    %246 = vector.load %arg2[%245, %c0_132] : memref<512x128xf32, #tpu.memory_space<vmem>>, vector<1x128xf32>
    %c0_i32_133 = arith.constant 0 : i32
    %247 = arith.cmpi ne, %242, %c0_i32_133 : i32
    %248 = arith.extui %247 : i1 to i32
    %249 = arith.sitofp %248 : i32 to f32
    %250 = vector.broadcast %249 : f32 to vector<1x128xf32>
    %251 = arith.mulf %246, %250 : vector<1x128xf32>
    %c22_134 = arith.constant 22 : index
    %c0_135 = arith.constant 0 : index
    %252 = vector.load %arg4[%c22_134, %c0_135] : memref<32x128xf32, #tpu.memory_space<vmem>>, vector<1x128xf32>
    tpu.vector_store %arg4[%c22_134, %c0_135], %251 {strides = array<i32>} : memref<32x128xf32, #tpu.memory_space<vmem>>, vector<1x128xf32>,
    %c23 = arith.constant 23 : index
    %253 = memref.load %arg1[%c23] : memref<32xi32, #tpu.memory_space<smem>>
    %c0_i32_136 = arith.constant 0 : i32
    %c511_i32_137 = arith.constant 511 : i32
    %254 = arith.maxsi %c0_i32_136, %253 : i32
    %255 = arith.minsi %c511_i32_137, %254 : i32
    %256 = arith.index_cast %255 : i32 to index
    %c0_138 = arith.constant 0 : index
    %257 = vector.load %arg2[%256, %c0_138] : memref<512x128xf32, #tpu.memory_space<vmem>>, vector<1x128xf32>
    %c0_i32_139 = arith.constant 0 : i32
    %258 = arith.cmpi ne, %253, %c0_i32_139 : i32
    %259 = arith.extui %258 : i1 to i32
    %260 = arith.sitofp %259 : i32 to f32
    %261 = vector.broadcast %260 : f32 to vector<1x128xf32>
    %262 = arith.mulf %257, %261 : vector<1x128xf32>
    %c23_140 = arith.constant 23 : index
    %c0_141 = arith.constant 0 : index
    %263 = vector.load %arg4[%c23_140, %c0_141] : memref<32x128xf32, #tpu.memory_space<vmem>>, vector<1x128xf32>
    tpu.vector_store %arg4[%c23_140, %c0_141], %262 {strides = array<i32>} : memref<32x128xf32, #tpu.memory_space<vmem>>, vector<1x128xf32>,
    %c24 = arith.constant 24 : index
    %264 = memref.load %arg1[%c24] : memref<32xi32, #tpu.memory_space<smem>>
    %c0_i32_142 = arith.constant 0 : i32
    %c511_i32_143 = arith.constant 511 : i32
    %265 = arith.maxsi %c0_i32_142, %264 : i32
    %266 = arith.minsi %c511_i32_143, %265 : i32
    %267 = arith.index_cast %266 : i32 to index
    %c0_144 = arith.constant 0 : index
    %268 = vector.load %arg2[%267, %c0_144] : memref<512x128xf32, #tpu.memory_space<vmem>>, vector<1x128xf32>
    %c0_i32_145 = arith.constant 0 : i32
    %269 = arith.cmpi ne, %264, %c0_i32_145 : i32
    %270 = arith.extui %269 : i1 to i32
    %271 = arith.sitofp %270 : i32 to f32
    %272 = vector.broadcast %271 : f32 to vector<1x128xf32>
    %273 = arith.mulf %268, %272 : vector<1x128xf32>
    %c24_146 = arith.constant 24 : index
    %c0_147 = arith.constant 0 : index
    %274 = vector.load %arg4[%c24_146, %c0_147] : memref<32x128xf32, #tpu.memory_space<vmem>>, vector<1x128xf32>
    tpu.vector_store %arg4[%c24_146, %c0_147], %273 {strides = array<i32>} : memref<32x128xf32, #tpu.memory_space<vmem>>, vector<1x128xf32>,
    %c25 = arith.constant 25 : index
    %275 = memref.load %arg1[%c25] : memref<32xi32, #tpu.memory_space<smem>>
    %c0_i32_148 = arith.constant 0 : i32
    %c511_i32_149 = arith.constant 511 : i32
    %276 = arith.maxsi %c0_i32_148, %275 : i32
    %277 = arith.minsi %c511_i32_149, %276 : i32
    %278 = arith.index_cast %277 : i32 to index
    %c0_150 = arith.constant 0 : index
    %279 = vector.load %arg2[%278, %c0_150] : memref<512x128xf32, #tpu.memory_space<vmem>>, vector<1x128xf32>
    %c0_i32_151 = arith.constant 0 : i32
    %280 = arith.cmpi ne, %275, %c0_i32_151 : i32
    %281 = arith.extui %280 : i1 to i32
    %282 = arith.sitofp %281 : i32 to f32
    %283 = vector.broadcast %282 : f32 to vector<1x128xf32>
    %284 = arith.mulf %279, %283 : vector<1x128xf32>
    %c25_152 = arith.constant 25 : index
    %c0_153 = arith.constant 0 : index
    %285 = vector.load %arg4[%c25_152, %c0_153] : memref<32x128xf32, #tpu.memory_space<vmem>>, vector<1x128xf32>
    tpu.vector_store %arg4[%c25_152, %c0_153], %284 {strides = array<i32>} : memref<32x128xf32, #tpu.memory_space<vmem>>, vector<1x128xf32>,
    %c26 = arith.constant 26 : index
    %286 = memref.load %arg1[%c26] : memref<32xi32, #tpu.memory_space<smem>>
    %c0_i32_154 = arith.constant 0 : i32
    %c511_i32_155 = arith.constant 511 : i32
    %287 = arith.maxsi %c0_i32_154, %286 : i32
    %288 = arith.minsi %c511_i32_155, %287 : i32
    %289 = arith.index_cast %288 : i32 to index
    %c0_156 = arith.constant 0 : index
    %290 = vector.load %arg2[%289, %c0_156] : memref<512x128xf32, #tpu.memory_space<vmem>>, vector<1x128xf32>
    %c0_i32_157 = arith.constant 0 : i32
    %291 = arith.cmpi ne, %286, %c0_i32_157 : i32
    %292 = arith.extui %291 : i1 to i32
    %293 = arith.sitofp %292 : i32 to f32
    %294 = vector.broadcast %293 : f32 to vector<1x128xf32>
    %295 = arith.mulf %290, %294 : vector<1x128xf32>
    %c26_158 = arith.constant 26 : index
    %c0_159 = arith.constant 0 : index
    %296 = vector.load %arg4[%c26_158, %c0_159] : memref<32x128xf32, #tpu.memory_space<vmem>>, vector<1x128xf32>
    tpu.vector_store %arg4[%c26_158, %c0_159], %295 {strides = array<i32>} : memref<32x128xf32, #tpu.memory_space<vmem>>, vector<1x128xf32>,
    %c27 = arith.constant 27 : index
    %297 = memref.load %arg1[%c27] : memref<32xi32, #tpu.memory_space<smem>>
    %c0_i32_160 = arith.constant 0 : i32
    %c511_i32_161 = arith.constant 511 : i32
    %298 = arith.maxsi %c0_i32_160, %297 : i32
    %299 = arith.minsi %c511_i32_161, %298 : i32
    %300 = arith.index_cast %299 : i32 to index
    %c0_162 = arith.constant 0 : index
    %301 = vector.load %arg2[%300, %c0_162] : memref<512x128xf32, #tpu.memory_space<vmem>>, vector<1x128xf32>
    %c0_i32_163 = arith.constant 0 : i32
    %302 = arith.cmpi ne, %297, %c0_i32_163 : i32
    %303 = arith.extui %302 : i1 to i32
    %304 = arith.sitofp %303 : i32 to f32
    %305 = vector.broadcast %304 : f32 to vector<1x128xf32>
    %306 = arith.mulf %301, %305 : vector<1x128xf32>
    %c27_164 = arith.constant 27 : index
    %c0_165 = arith.constant 0 : index
    %307 = vector.load %arg4[%c27_164, %c0_165] : memref<32x128xf32, #tpu.memory_space<vmem>>, vector<1x128xf32>
    tpu.vector_store %arg4[%c27_164, %c0_165], %306 {strides = array<i32>} : memref<32x128xf32, #tpu.memory_space<vmem>>, vector<1x128xf32>,
    %c28 = arith.constant 28 : index
    %308 = memref.load %arg1[%c28] : memref<32xi32, #tpu.memory_space<smem>>
    %c0_i32_166 = arith.constant 0 : i32
    %c511_i32_167 = arith.constant 511 : i32
    %309 = arith.maxsi %c0_i32_166, %308 : i32
    %310 = arith.minsi %c511_i32_167, %309 : i32
    %311 = arith.index_cast %310 : i32 to index
    %c0_168 = arith.constant 0 : index
    %312 = vector.load %arg2[%311, %c0_168] : memref<512x128xf32, #tpu.memory_space<vmem>>, vector<1x128xf32>
    %c0_i32_169 = arith.constant 0 : i32
    %313 = arith.cmpi ne, %308, %c0_i32_169 : i32
    %314 = arith.extui %313 : i1 to i32
    %315 = arith.sitofp %314 : i32 to f32
    %316 = vector.broadcast %315 : f32 to vector<1x128xf32>
    %317 = arith.mulf %312, %316 : vector<1x128xf32>
    %c28_170 = arith.constant 28 : index
    %c0_171 = arith.constant 0 : index
    %318 = vector.load %arg4[%c28_170, %c0_171] : memref<32x128xf32, #tpu.memory_space<vmem>>, vector<1x128xf32>
    tpu.vector_store %arg4[%c28_170, %c0_171], %317 {strides = array<i32>} : memref<32x128xf32, #tpu.memory_space<vmem>>, vector<1x128xf32>,
    %c29 = arith.constant 29 : index
    %319 = memref.load %arg1[%c29] : memref<32xi32, #tpu.memory_space<smem>>
    %c0_i32_172 = arith.constant 0 : i32
    %c511_i32_173 = arith.constant 511 : i32
    %320 = arith.maxsi %c0_i32_172, %319 : i32
    %321 = arith.minsi %c511_i32_173, %320 : i32
    %322 = arith.index_cast %321 : i32 to index
    %c0_174 = arith.constant 0 : index
    %323 = vector.load %arg2[%322, %c0_174] : memref<512x128xf32, #tpu.memory_space<vmem>>, vector<1x128xf32>
    %c0_i32_175 = arith.constant 0 : i32
    %324 = arith.cmpi ne, %319, %c0_i32_175 : i32
    %325 = arith.extui %324 : i1 to i32
    %326 = arith.sitofp %325 : i32 to f32
    %327 = vector.broadcast %326 : f32 to vector<1x128xf32>
    %328 = arith.mulf %323, %327 : vector<1x128xf32>
    %c29_176 = arith.constant 29 : index
    %c0_177 = arith.constant 0 : index
    %329 = vector.load %arg4[%c29_176, %c0_177] : memref<32x128xf32, #tpu.memory_space<vmem>>, vector<1x128xf32>
    tpu.vector_store %arg4[%c29_176, %c0_177], %328 {strides = array<i32>} : memref<32x128xf32, #tpu.memory_space<vmem>>, vector<1x128xf32>,
    %c30 = arith.constant 30 : index
    %330 = memref.load %arg1[%c30] : memref<32xi32, #tpu.memory_space<smem>>
    %c0_i32_178 = arith.constant 0 : i32
    %c511_i32_179 = arith.constant 511 : i32
    %331 = arith.maxsi %c0_i32_178, %330 : i32
    %332 = arith.minsi %c511_i32_179, %331 : i32
    %333 = arith.index_cast %332 : i32 to index
    %c0_180 = arith.constant 0 : index
    %334 = vector.load %arg2[%333, %c0_180] : memref<512x128xf32, #tpu.memory_space<vmem>>, vector<1x128xf32>
    %c0_i32_181 = arith.constant 0 : i32
    %335 = arith.cmpi ne, %330, %c0_i32_181 : i32
    %336 = arith.extui %335 : i1 to i32
    %337 = arith.sitofp %336 : i32 to f32
    %338 = vector.broadcast %337 : f32 to vector<1x128xf32>
    %339 = arith.mulf %334, %338 : vector<1x128xf32>
    %c30_182 = arith.constant 30 : index
    %c0_183 = arith.constant 0 : index
    %340 = vector.load %arg4[%c30_182, %c0_183] : memref<32x128xf32, #tpu.memory_space<vmem>>, vector<1x128xf32>
    tpu.vector_store %arg4[%c30_182, %c0_183], %339 {strides = array<i32>} : memref<32x128xf32, #tpu.memory_space<vmem>>, vector<1x128xf32>,
    %c31 = arith.constant 31 : index
    %341 = memref.load %arg1[%c31] : memref<32xi32, #tpu.memory_space<smem>>
    %c0_i32_184 = arith.constant 0 : i32
    %c511_i32_185 = arith.constant 511 : i32
    %342 = arith.maxsi %c0_i32_184, %341 : i32
    %343 = arith.minsi %c511_i32_185, %342 : i32
    %344 = arith.index_cast %343 : i32 to index
    %c0_186 = arith.constant 0 : index
    %345 = vector.load %arg2[%344, %c0_186] : memref<512x128xf32, #tpu.memory_space<vmem>>, vector<1x128xf32>
    %c0_i32_187 = arith.constant 0 : i32
    %346 = arith.cmpi ne, %341, %c0_i32_187 : i32
    %347 = arith.extui %346 : i1 to i32
    %348 = arith.sitofp %347 : i32 to f32
    %349 = vector.broadcast %348 : f32 to vector<1x128xf32>
    %350 = arith.mulf %345, %349 : vector<1x128xf32>
    %c31_188 = arith.constant 31 : index
    %c0_189 = arith.constant 0 : index
    %351 = vector.load %arg4[%c31_188, %c0_189] : memref<32x128xf32, #tpu.memory_space<vmem>>, vector<1x128xf32>
    tpu.vector_store %arg4[%c31_188, %c0_189], %350 {strides = array<i32>} : memref<32x128xf32, #tpu.memory_space<vmem>>, vector<1x128xf32>,
    %c0_190 = arith.constant 0 : index
    %c0_191 = arith.constant 0 : index
    %352 = vector.load %arg4[%c0_190, %c0_191] : memref<32x128xf32, #tpu.memory_space<vmem>>, vector<32x128xf32>
    %c0_192 = arith.constant 0 : index
    %c0_193 = arith.constant 0 : index
    %353 = vector.load %arg3[%c0_192, %c0_193] : memref<32x128xf32, #tpu.memory_space<vmem>>, vector<32x128xf32>
    %354 = arith.mulf %352, %353 : vector<32x128xf32>
    %c0_194 = arith.constant 0 : index
    %c0_195 = arith.constant 0 : index
    %355 = vector.load %arg4[%c0_194, %c0_195] : memref<32x128xf32, #tpu.memory_space<vmem>>, vector<32x128xf32>
    tpu.vector_store %arg4[%c0_194, %c0_195], %354 {strides = array<i32>} : memref<32x128xf32, #tpu.memory_space<vmem>>, vector<32x128xf32>,
    return
  }
  func.func @transform_0(%arg0: i32, %arg1: memref<32xi32, #tpu.memory_space<smem>>) -> (i32, i32) {
    %c0_i32 = arith.constant 0 : i32
    %c0_i32_0 = arith.constant 0 : i32
    %c0_i32_1 = arith.constant 0 : i32
    return %c0_i32, %c0_i32_0 : i32, i32
  }
  func.func @transform_1(%arg0: i32, %arg1: memref<32xi32, #tpu.memory_space<smem>>) -> (i32, i32) {
    %c0_i32 = arith.constant 0 : i32
    %c0_i32_0 = arith.constant 0 : i32
    %c0_i32_1 = arith.constant 0 : i32
    return %c0_i32, %c0_i32_0 : i32, i32
  }
  func.func @transform_2(%arg0: i32, %arg1: memref<32xi32, #tpu.memory_space<smem>>) -> (i32, i32) {
    %c0_i32 = arith.constant 0 : i32
    %c0_i32_0 = arith.constant 0 : i32
    %c0_i32_1 = arith.constant 0 : i32
    return %c0_i32, %c0_i32_0 : i32, i32
  }
}

</mosaic_0001>

<bundles_post_ra>
// kernel: wordrep_forward.1
= control target key start
LH: loop header
LB: loop body
LE: loop exit
PB: predicated region body
PF: predicated region fallthrough
CT: control target
= control target key end

     0   :  { %s1074_s0 = inlined_call_operand.vmem [shape: s32[32], index: 0, kind: input, shape index: {}]   ;;  %s1075_s1 = inlined_call_operand.hbm [shape: f32[512,128], index: 1, kind: input, shape index: {}]   ;;  %s1076_s2 = inlined_call_operand.vmem [shape: f32[32,128], index: 2, kind: input, shape index: {}]   ;;  %s1077_s3 = inlined_call_operand.hbm [shape: f32[32,128], index: 3, kind: output, shape index: {}]  }
   0x1   :  { %s8_s14 = sshll.u32 %s1074_s0, 4  ;;  %s9_s14 = int_to_ptr.vmem [resolvable:$true] %s8_s14 }
   0x2   :  { %s774_s15 = scalar_lea.vmem %s9_s14, 16  ;;  %p779_p1 = scmp.lt.s32.totalorder %s9_s14, %s9_s14 }
   0x3   :  { %p775_p0 = scmp.ne.s32.totalorder %s9_s14, %s774_s15  ;;  %p780_p2 = scmp.lt.s32.totalorder %s774_s15, %s774_s15 }
   0x5   :  { %p781_p3 = por %p780_p2, %p779_p1 }
   0x7   :  { %p782_p4 = pnand %p781_p3, %p775_p0 }
   0x9   :  { %785 = shalt.err (!%p782_p4)  }
   0xa   :  { %s836_s16 = smov [#allocation3]  }
   0xb   :  { %11 = dma.vmem_to_smem %s9_s14, 16, %s836_s16, [#allocation2] }
   0xc   :  { %830 = dma.done.wait [#allocation2], 16 }
   0xd   :  { %831 = vsyncadd [#allocation2], 4294967280 }
   0xe   :  { %13 = sfence }
   0xf   :  { %14 = vsyncpa [#allocation5], 0 }
  0x10   :  { %15 = vsyncpa [#allocation6], 0  ;;  %s837_s17 = smov [#allocation4]   ;;  %s786_s20 = scalar_lea.hbm %s1075_s1, 8192 }
  0x11   :  { %s21_s18 = sshll.u32 %s837_s17, 4  ;;  %p787_p5 = scmp.ne.s32.totalorder %s1075_s1, %s786_s20  ;;  %s22_s18 = int_to_ptr.vmem [resolvable:$true] %s21_s18 }
  0x12   :  { %p790_p6 = scmp.lt.u32.totalorder %s786_s20, %s1075_s1 }
  0x14   :  { %p792_p7 = pnand %p790_p6, %p787_p5 }
  0x16   :  { %795 = shalt.err (!%p792_p7)
}
  0x17   :  { %s796_s25 = scalar_lea.vmem %s22_s18, 8192  ;;  %p801_p9 = scmp.lt.s32.totalorder %s22_s18, %s22_s18 }
  0x18   :  { %p797_p8 = scmp.ne.s32.totalorder %s22_s18, %s796_s25  ;;  %p802_p10 = scmp.lt.s32.totalorder %s796_s25, %s796_s25 }
  0x1a   :  { %p803_p11 = por %p802_p10, %p801_p9 }
  0x1c   :  { %p804_p12 = pnand %p803_p11, %p797_p8 }
  0x1e   :  { %807 = shalt.err (!%p804_p12)
}
  0x1f   :  { %s838_s26 = smov 128   ;;  %s839_s27 = smov 8  }
  0x20   :  { %27 = dma.hbm_to_vmem [thread:$0]  %s1075_s1, 8192, %s22_s18, [#allocation5], %s838_s26, %s838_s26, %s839_s27  }
  0x21   :  { %832 = dma.done.wait [#allocation5], 8192  }
  0x22   :  { %833 = vsyncadd [#allocation5], 4294959104  ;;  %s33_s30 = sld [smem:[#allocation3]]  ;;  %s519_s4 = sld [smem:[#allocation3 + $0x1]]  ;;  %v453_v32 = vld [vmem:[%s1076_s2] sm:$0xff]  ;;  %v454_v54 = vld [vmem:[%s1076_s2 + $0x8] sm:$0xff] }
  0x23   :  { %s879_s5 = sld [smem:[#allocation3 + $0x2]]  ;;  %s881_s6 = sld [smem:[#allocation3 + $0x3]] }
  0x24   :  { %s883_s7 = sld [smem:[#allocation3 + $0x4]]  ;;  %s885_s8 = sld [smem:[#allocation3 + $0x5]] }
  0x25   :  { %s887_s9 = sld [smem:[#allocation3 + $0x6]]  ;;  %s889_s10 = sld [smem:[#allocation3 + $0x7]] }
  0x26   :  { %s891_s11 = sld [smem:[#allocation3 + $0x8]]  ;;  %s893_s12 = sld [smem:[#allocation3 + $0x9]] }
  0x27   :  { %s895_s1 = sld [smem:[#allocation3 + $0xa]]  ;;  %s897_s13 = sld [smem:[#allocation3 + $0xb]] }
  0x28   :  { %p34_p13 = scmp.gt.s32.totalorder %s33_s30, 0  ;;  %p514_p0 = scmp.lt.s32.totalorder %s33_s30, 511 }
  0x29   :  { %p40_p1 = scmp.ne.s32.totalorder %s33_s30, 0  ;;  %p47_p2 = scmp.gt.s32.totalorder %s519_s4, 0 }
  0x2a   :  { %s1079_s30 = smov (!%p34_p13, %s33_s30), 0  ;;  %p520_p3 = scmp.lt.s32.totalorder %s519_s4, 511 }
  0x2b   :  { %s41_s14 = scalar_select %p40_p1, 1, 0 }
  0x2c   :  { %s1081_s30 = smov (!%p514_p0, %s1079_s30), 511  ;;  %p53_p4 = scmp.ne.s32.totalorder %s519_s4, 0 }
  0x2d   :  { %s42_s15 = scvt.s32.f32 %s41_s14  ;;  %s38_s16 = scalar_lea.vmem [#allocation4], %s1081_s30 }
  0x2e   :  { %v39_v0 = vld [vmem:[%s38_s16] sm:$0x1]  ;;  %s1083_s4 = smov (!%p47_p2, %s519_s4), 0  ;;  %p60_p5 = scmp.gt.s32.totalorder %s879_s5, 0 }
  0x2f   :  { %v43_v1 = vstv %s42_s15  ;;  %s54_s17 = scalar_select %p53_p4, 1, 0 }
  0x30   :  { %v44_v2 = vmul.f32 %v43_v1, %v39_v0  ;;  %s1085_s4 = smov (!%p520_p3, %s1083_s4), 511  ;;  %p526_p6 = scmp.lt.s32.totalorder %s879_s5, 511 }
  0x31   :  { %s55_s18 = scvt.s32.f32 %s54_s17  ;;  %s51_s19 = scalar_lea.vmem [#allocation4], %s1085_s4 }
  0x32   :  { %45 = vst [vmem:[#allocation7] sm:$0x1] %v44_v2  ;;  %v52_v3 = vld [vmem:[%s51_s19] sm:$0x1]  ;;  %s61_s0 = scalar_select %p60_p5, %s879_s5, 0 }
  0x33   :  { %v56_v4 = vstv %s55_s18  ;;  %p66_p7 = scmp.ne.s32.totalorder %s879_s5, 0  ;;  %p73_p8 = scmp.gt.s32.totalorder %s881_s6, 0 }
  0x34   :  { %v57_v5 = vmul.f32 %v56_v4, %v52_v3  ;;  %s1087_s0 = smov (!%p526_p6, %s61_s0), 511  ;;  %p532_p9 = scmp.lt.s32.totalorder %s881_s6, 511 }
  0x35   :  { %s67_s20 = scalar_select %p66_p7, 1, 0 }
  0x36   :  { %58 = vst [vmem:[#allocation7 + $0x1] sm:$0x1] %v57_v5  ;;  %s64_s21 = scalar_lea.vmem [#allocation4], %s1087_s0  ;;  %p79_p10 = scmp.ne.s32.totalorder %s881_s6, 0 }
  0x37   :  { %v65_v6 = vld [vmem:[%s64_s21] sm:$0x1]  ;;  %s68_s22 = scvt.s32.f32 %s67_s20  ;;  %s1089_s6 = smov (!%p73_p8, %s881_s6), 0 }
  0x38   :  { %s80_s23 = scalar_select %p79_p10, 1, 0 }
  0x39   :  { %v69_v7 = vstv %s68_s22  ;;  %s1091_s6 = smov (!%p532_p9, %s1089_s6), 511  ;;  %p86_p11 = scmp.gt.s32.totalorder %s883_s7, 0 }
  0x3a   :  { %v70_v8 = vmul.f32 %v69_v7, %v65_v6  ;;  %s81_s24 = scvt.s32.f32 %s80_s23  ;;  %p538_p12 = scmp.lt.s32.totalorder %s883_s7, 511 }
  0x3b   :  { %s77_s25 = scalar_lea.vmem [#allocation4], %s1091_s6  ;;  %p92_p13 = scmp.ne.s32.totalorder %s883_s7, 0 }
  0x3c   :  { %71 = vst [vmem:[#allocation7 + $0x2] sm:$0x1] %v70_v8  ;;  %v78_v9 = vld [vmem:[%s77_s25] sm:$0x1]  ;;  %v82_v10 = vstv %s81_s24  ;;  %s87_s28 = scalar_select %p86_p11, %s883_s7, 0 }
  0x3d   :  { %v83_v11 = vmul.f32 %v82_v10, %v78_v9  ;;  %p99_p0 = scmp.gt.s32.totalorder %s885_s8, 0  ;;  %p544_p1 = scmp.lt.s32.totalorder %s885_s8, 511 }
  0x3e   :  { %s1093_s28 = smov (!%p538_p12, %s87_s28), 511  ;;  %p105_p2 = scmp.ne.s32.totalorder %s885_s8, 0 }
  0x3f   :  { %84 = vst [vmem:[#allocation7 + $0x3] sm:$0x1] %v83_v11  ;;  %s93_s29 = scalar_select %p92_p13, 1, 0 }
  0x40   :  { %s90_s30 = scalar_lea.vmem [#allocation4], %s1093_s28  ;;  %s1095_s8 = smov (!%p99_p0, %s885_s8), 0 }
  0x41   :  { %v91_v12 = vld [vmem:[%s90_s30] sm:$0x1]  ;;  %s94_s4 = scvt.s32.f32 %s93_s29  ;;  %s1097_s8 = smov (!%p544_p1, %s1095_s8), 511 }
  0x42   :  { %s106_s5 = scalar_select %p105_p2, 1, 0 }
  0x43   :  { %v95_v13 = vstv %s94_s4  ;;  %p112_p3 = scmp.gt.s32.totalorder %s887_s9, 0  ;;  %p550_p4 = scmp.lt.s32.totalorder %s887_s9, 511 }
  0x44   :  { %v96_v14 = vmul.f32 %v95_v13, %v91_v12  ;;  %s107_s6 = scvt.s32.f32 %s106_s5  ;;  %s103_s7 = scalar_lea.vmem [#allocation4], %s1097_s8 }
  0x45   :  { %v104_v15 = vld [vmem:[%s103_s7] sm:$0x1]  ;;  %s113_s14 = scalar_select %p112_p3, %s887_s9, 0 }
  0x46   :  { %97 = vst [vmem:[#allocation7 + $0x4] sm:$0x1] %v96_v14  ;;  %v108_v16 = vstv %s107_s6  ;;  %p118_p5 = scmp.ne.s32.totalorder %s887_s9, 0  ;;  %p125_p6 = scmp.gt.s32.totalorder %s889_s10, 0 }
  0x47   :  { %v109_v17 = vmul.f32 %v108_v16, %v104_v15  ;;  %s1099_s14 = smov (!%p550_p4, %s113_s14), 511  ;;  %p556_p7 = scmp.lt.s32.totalorder %s889_s10, 511 }
  0x48   :  { %s119_s15 = scalar_select %p118_p5, 1, 0 }
  0x49   :  { %110 = vst [vmem:[#allocation7 + $0x5] sm:$0x1] %v109_v17  ;;  %s116_s16 = scalar_lea.vmem [#allocation4], %s1099_s14  ;;  %p131_p8 = scmp.ne.s32.totalorder %s889_s10, 0  ;;  %v455_v17 = vld [vmem:[%s1076_s2 + $0x10] sm:$0xff] }
  0x4a   :  { %v117_v18 = vld [vmem:[%s116_s16] sm:$0x1]  ;;  %s120_s17 = scvt.s32.f32 %s119_s15  ;;  %s1101_s10 = smov (!%p125_p6, %s889_s10), 0 }
  0x4b   :  { %s132_s8 = scalar_select %p131_p8, 1, 0 }
  0x4c   :  { %v121_v19 = vstv %s120_s17  ;;  %s1103_s10 = smov (!%p556_p7, %s1101_s10), 511  ;;  %p138_p9 = scmp.gt.s32.totalorder %s891_s11, 0 }
  0x4d   :  { %v122_v20 = vmul.f32 %v121_v19, %v117_v18  ;;  %s133_s9 = scvt.s32.f32 %s132_s8  ;;  %p562_p10 = scmp.lt.s32.totalorder %s891_s11, 511 }
  0x4e   :  { %s129_s18 = scalar_lea.vmem [#allocation4], %s1103_s10  ;;  %p144_p11 = scmp.ne.s32.totalorder %s891_s11, 0 }
  0x4f   :  { %123 = vst [vmem:[#allocation7 + $0x6] sm:$0x1] %v122_v20  ;;  %v130_v21 = vld [vmem:[%s129_s18] sm:$0x1]  ;;  %v134_v22 = vstv %s133_s9  ;;  %s139_s19 = scalar_select %p138_p9, %s891_s11, 0 }
  0x50   :  { %v135_v23 = vmul.f32 %v134_v22, %v130_v21  ;;  %p151_p12 = scmp.gt.s32.totalorder %s893_s12, 0  ;;  %p568_p13 = scmp.lt.s32.totalorder %s893_s12, 511 }
  0x51   :  { %s1105_s19 = smov (!%p562_p10, %s139_s19), 511  ;;  %p157_p0 = scmp.ne.s32.totalorder %s893_s12, 0 }
  0x52   :  { %136 = vst [vmem:[#allocation7 + $0x7] sm:$0x1] %v135_v23  ;;  %s145_s0 = scalar_select %p144_p11, 1, 0 }
  0x53   :  { %s142_s20 = scalar_lea.vmem [#allocation4], %s1105_s19  ;;  %s1107_s12 = smov (!%p151_p12, %s893_s12), 0 }
  0x54   :  { %v143_v24 = vld [vmem:[%s142_s20] sm:$0x1]  ;;  %s146_s21 = scvt.s32.f32 %s145_s0  ;;  %s1109_s12 = smov (!%p568_p13, %s1107_s12), 511 }
  0x55   :  { %s158_s10 = scalar_select %p157_p0, 1, 0 }
  0x56   :  { %v147_v25 = vstv %s146_s21  ;;  %p164_p1 = scmp.gt.s32.totalorder %s895_s1, 0  ;;  %p574_p2 = scmp.lt.s32.totalorder %s895_s1, 511 }
  0x57   :  { %v148_v26 = vmul.f32 %v147_v25, %v143_v24  ;;  %s159_s11 = scvt.s32.f32 %s158_s10  ;;  %s155_s22 = scalar_lea.vmem [#allocation4], %s1109_s12 }
  0x58   :  { %v156_v27 = vld [vmem:[%s155_s22] sm:$0x1]  ;;  %s165_s23 = scalar_select %p164_p1, %s895_s1, 0 }
  0x59   :  { %149 = vst [vmem:[#allocation7 + $0x8] sm:$0x1] %v148_v26  ;;  %v160_v28 = vstv %s159_s11  ;;  %p170_p3 = scmp.ne.s32.totalorder %s895_s1, 0  ;;  %p177_p4 = scmp.gt.s32.totalorder %s897_s13, 0  ;;  %v449_v31 = vld [vmem:[#allocation7] sm:$0xff] }
  0x5a   :  { %v161_v29 = vmul.f32 %v160_v28, %v156_v27  ;;  %s1111_s23 = smov (!%p574_p2, %s165_s23), 511  ;;  %p580_p5 = scmp.lt.s32.totalorder %s897_s13, 511  ;;  %v457_v34 = vmul.f32 %v453_v32, %v449_v31 }
  0x5b   :  { %s171_s24 = scalar_select %p170_p3, 1, 0 }
  0x5c   :  { %162 = vst [vmem:[#allocation7 + $0x9] sm:$0x1] %v161_v29  ;;  %s168_s25 = scalar_lea.vmem [#allocation4], %s1111_s23  ;;  %p183_p6 = scmp.ne.s32.totalorder %s897_s13, 0  ;;  %461 = vst [vmem:[#allocation7] sm:$0xff] %v457_v34 }
  0x5d   :  { %v169_v30 = vld [vmem:[%s168_s25] sm:$0x1]  ;;  %s172_s28 = scvt.s32.f32 %s171_s24  ;;  %s1113_s13 = smov (!%p177_p4, %s897_s13), 0 }
  0x5e   :  { %s184_s12 = scalar_select %p183_p6, 1, 0 }
  0x5f   :  { %v173_v33 = vstv %s172_s28  ;;  %s1115_s13 = smov (!%p580_p5, %s1113_s13), 511  ;;  %s585_s4 = sld [smem:[#allocation3 + $0xc]] }
  0x60   :  { %v174_v35 = vmul.f32 %v173_v33, %v169_v30  ;;  %s185_s1 = scvt.s32.f32 %s184_s12  ;;  %s942_s5 = sld [smem:[#allocation3 + $0xd]] }
  0x61   :  { %s181_s6 = scalar_lea.vmem [#allocation4], %s1115_s13  ;;  %s944_s7 = sld [smem:[#allocation3 + $0xe]] }
  0x62   :  { %175 = vst [vmem:[#allocation7 + $0xa] sm:$0x1] %v174_v35  ;;  %v182_v36 = vld [vmem:[%s181_s6] sm:$0x1]  ;;  %v186_v37 = vstv %s185_s1  ;;  %s946_s14 = sld [smem:[#allocation3 + $0xf]]  ;;  %s948_s15 = sld [smem:[#allocation3 + $0x10]] }
  0x63   :  { %v187_v38 = vmul.f32 %v186_v37, %v182_v36  ;;  %s950_s16 = sld [smem:[#allocation3 + $0x11]]  ;;  %s952_s17 = sld [smem:[#allocation3 + $0x12]] }
  0x64   :  { %s954_s8 = sld [smem:[#allocation3 + $0x13]]  ;;  %s956_s13 = sld [smem:[#allocation3 + $0x14]] }
  0x65   :  { %188 = vst [vmem:[#allocation7 + $0xb] sm:$0x1] %v187_v38  ;;  %s958_s9 = sld [smem:[#allocation3 + $0x15]]  ;;  %p190_p7 = scmp.gt.s32.totalorder %s585_s4, 0 }
  0x66   :  { %p586_p8 = scmp.lt.s32.totalorder %s585_s4, 511  ;;  %p196_p9 = scmp.ne.s32.totalorder %s585_s4, 0 }
  0x67   :  { %p203_p10 = scmp.gt.s32.totalorder %s942_s5, 0  ;;  %s1117_s4 = smov (!%p190_p7, %s585_s4), 0 }
  0x68   :  { %s197_s18 = scalar_select %p196_p9, 1, 0 }
  0x69   :  { %s1119_s4 = smov (!%p586_p8, %s1117_s4), 511  ;;  %p592_p11 = scmp.lt.s32.totalorder %s942_s5, 511 }
  0x6a   :  { %s198_s19 = scvt.s32.f32 %s197_s18  ;;  %p209_p12 = scmp.ne.s32.totalorder %s942_s5, 0 }
  0x6b   :  { %s194_s0 = scalar_lea.vmem [#allocation4], %s1119_s4  ;;  %s1121_s5 = smov (!%p203_p10, %s942_s5), 0 }
  0x6c   :  { %v195_v39 = vld [vmem:[%s194_s0] sm:$0x1]  ;;  %v199_v40 = vstv %s198_s19  ;;  %s210_s20 = scalar_select %p209_p12, 1, 0 }
  0x6d   :  { %v200_v41 = vmul.f32 %v199_v40, %v195_v39  ;;  %s1123_s5 = smov (!%p592_p11, %s1121_s5), 511  ;;  %p216_p13 = scmp.gt.s32.totalorder %s944_s7, 0 }
  0x6e   :  { %s211_s21 = scvt.s32.f32 %s210_s20  ;;  %p598_p0 = scmp.lt.s32.totalorder %s944_s7, 511 }
  0x6f   :  { %201 = vst [vmem:[#allocation7 + $0xc] sm:$0x1] %v200_v41  ;;  %s207_s10 = scalar_lea.vmem [#allocation4], %s1123_s5  ;;  %p222_p1 = scmp.ne.s32.totalorder %s944_s7, 0  ;;  %v456_v41 = vld [vmem:[%s1076_s2 + $0x18] sm:$0xff] }
  0x70   :  { %v208_v42 = vld [vmem:[%s207_s10] sm:$0x1]  ;;  %v212_v43 = vstv %s211_s21  ;;  %s217_s11 = scalar_select %p216_p13, %s944_s7, 0 }
  0x71   :  { %v213_v44 = vmul.f32 %v212_v43, %v208_v42  ;;  %p229_p2 = scmp.gt.s32.totalorder %s946_s14, 0  ;;  %p604_p3 = scmp.lt.s32.totalorder %s946_s14, 511 }
  0x72   :  { %s1125_s11 = smov (!%p598_p0, %s217_s11), 511  ;;  %p235_p4 = scmp.ne.s32.totalorder %s946_s14, 0 }
  0x73   :  { %214 = vst [vmem:[#allocation7 + $0xd] sm:$0x1] %v213_v44  ;;  %s223_s22 = scalar_select %p222_p1, 1, 0 }
  0x74   :  { %s220_s23 = scalar_lea.vmem [#allocation4], %s1125_s11  ;;  %s1127_s14 = smov (!%p229_p2, %s946_s14), 0 }
  0x75   :  { %v221_v45 = vld [vmem:[%s220_s23] sm:$0x1]  ;;  %s224_s24 = scvt.s32.f32 %s223_s22  ;;  %s1129_s14 = smov (!%p604_p3, %s1127_s14), 511 }
  0x76   :  { %s236_s25 = scalar_select %p235_p4, 1, 0 }
  0x77   :  { %v225_v46 = vstv %s224_s24  ;;  %p242_p5 = scmp.gt.s32.totalorder %s948_s15, 0  ;;  %p610_p6 = scmp.lt.s32.totalorder %s948_s15, 511 }
  0x78   :  { %v226_v47 = vmul.f32 %v225_v46, %v221_v45  ;;  %s237_s28 = scvt.s32.f32 %s236_s25  ;;  %s233_s29 = scalar_lea.vmem [#allocation4], %s1129_s14 }
  0x79   :  { %v234_v48 = vld [vmem:[%s233_s29] sm:$0x1]  ;;  %s243_s30 = scalar_select %p242_p5, %s948_s15, 0 }
  0x7a   :  { %227 = vst [vmem:[#allocation7 + $0xe] sm:$0x1] %v226_v47  ;;  %v238_v49 = vstv %s237_s28  ;;  %p248_p7 = scmp.ne.s32.totalorder %s948_s15, 0  ;;  %p255_p8 = scmp.gt.s32.totalorder %s950_s16, 0 }
  0x7b   :  { %v239_v50 = vmul.f32 %v238_v49, %v234_v48  ;;  %s1131_s30 = smov (!%p610_p6, %s243_s30), 511  ;;  %p616_p9 = scmp.lt.s32.totalorder %s950_s16, 511 }
  0x7c   :  { %s249_s12 = scalar_select %p248_p7, 1, 0 }
  0x7d   :  { %240 = vst [vmem:[#allocation7 + $0xf] sm:$0x1] %v239_v50  ;;  %s246_s1 = scalar_lea.vmem [#allocation4], %s1131_s30  ;;  %p261_p10 = scmp.ne.s32.totalorder %s950_s16, 0 }
  0x7e   :  { %v247_v51 = vld [vmem:[%s246_s1] sm:$0x1]  ;;  %s250_s4 = scvt.s32.f32 %s249_s12  ;;  %s1133_s16 = smov (!%p255_p8, %s950_s16), 0 }
  0x7f   :  { %s262_s5 = scalar_select %p261_p10, 1, 0 }
  0x80   :  { %v251_v52 = vstv %s250_s4  ;;  %s1135_s16 = smov (!%p616_p9, %s1133_s16), 511  ;;  %p268_p11 = scmp.gt.s32.totalorder %s952_s17, 0 }
  0x81   :  { %v252_v53 = vmul.f32 %v251_v52, %v247_v51  ;;  %s263_s14 = scvt.s32.f32 %s262_s5  ;;  %p622_p12 = scmp.lt.s32.totalorder %s952_s17, 511 }
  0x82   :  { %s259_s15 = scalar_lea.vmem [#allocation4], %s1135_s16  ;;  %p274_p13 = scmp.ne.s32.totalorder %s952_s17, 0 }
  0x83   :  { %253 = vst [vmem:[#allocation7 + $0x10] sm:$0x1] %v252_v53  ;;  %v260_v56 = vld [vmem:[%s259_s15] sm:$0x1]  ;;  %v264_v57 = vstv %s263_s14  ;;  %s269_s18 = scalar_select %p268_p11, %s952_s17, 0 }
  0x84   :  { %v450_v55 = vld [vmem:[#allocation7 + $0x8] sm:$0xff]  ;;  %v265_v59 = vmul.f32 %v264_v57, %v260_v56  ;;  %p281_p0 = scmp.gt.s32.totalorder %s954_s8, 0  ;;  %p628_p1 = scmp.lt.s32.totalorder %s954_s8, 511 }
  0x85   :  { %v458_v58 = vmul.f32 %v454_v54, %v450_v55  ;;  %s1137_s18 = smov (!%p622_p12, %s269_s18), 511  ;;  %p287_p2 = scmp.ne.s32.totalorder %s954_s8, 0 }
  0x86   :  { %266 = vst [vmem:[#allocation7 + $0x11] sm:$0x1] %v265_v59  ;;  %s275_s19 = scalar_select %p274_p13, 1, 0 }
  0x87   :  { %462 = vst [vmem:[#allocation7 + $0x8] sm:$0xff] %v458_v58  ;;  %s272_s0 = scalar_lea.vmem [#allocation4], %s1137_s18  ;;  %s1139_s8 = smov (!%p281_p0, %s954_s8), 0 }
  0x88   :  { %v273_v60 = vld [vmem:[%s272_s0] sm:$0x1]  ;;  %s276_s16 = scvt.s32.f32 %s275_s19  ;;  %s1141_s8 = smov (!%p628_p1, %s1139_s8), 511 }
  0x89   :  { %s288_s20 = scalar_select %p287_p2, 1, 0 }
  0x8a   :  { %v277_v61 = vstv %s276_s16  ;;  %p294_p3 = scmp.gt.s32.totalorder %s956_s13, 0  ;;  %p634_p4 = scmp.lt.s32.totalorder %s956_s13, 511 }
  0x8b   :  { %v278_v62 = vmul.f32 %v277_v61, %v273_v60  ;;  %s289_s17 = scvt.s32.f32 %s288_s20  ;;  %s285_s21 = scalar_lea.vmem [#allocation4], %s1141_s8 }
  0x8c   :  { %v286_v63 = vld [vmem:[%s285_s21] sm:$0x1]  ;;  %s295_s10 = scalar_select %p294_p3, %s956_s13, 0 }
  0x8d   :  { %279 = vst [vmem:[#allocation7 + $0x12] sm:$0x1] %v278_v62  ;;  %v290_v0 = vstv %s289_s17  ;;  %p300_p5 = scmp.ne.s32.totalorder %s956_s13, 0  ;;  %p307_p6 = scmp.gt.s32.totalorder %s958_s9, 0 }
  0x8e   :  { %v291_v1 = vmul.f32 %v290_v0, %v286_v63  ;;  %s1143_s10 = smov (!%p634_p4, %s295_s10), 511  ;;  %p640_p7 = scmp.lt.s32.totalorder %s958_s9, 511 }
  0x8f   :  { %s301_s11 = scalar_select %p300_p5, 1, 0 }
  0x90   :  { %292 = vst [vmem:[#allocation7 + $0x13] sm:$0x1] %v291_v1  ;;  %s298_s22 = scalar_lea.vmem [#allocation4], %s1143_s10  ;;  %p313_p8 = scmp.ne.s32.totalorder %s958_s9, 0 }
  0x91   :  { %v299_v2 = vld [vmem:[%s298_s22] sm:$0x1]  ;;  %s302_s23 = scvt.s32.f32 %s301_s11  ;;  %s1145_s9 = smov (!%p307_p6, %s958_s9), 0 }
  0x92   :  { %s314_s24 = scalar_select %p313_p8, 1, 0 }
  0x93   :  { %v303_v3 = vstv %s302_s23  ;;  %s1147_s9 = smov (!%p640_p7, %s1145_s9), 511  ;;  %s645_s25 = sld [smem:[#allocation3 + $0x16]] }
  0x94   :  { %v304_v4 = vmul.f32 %v303_v3, %v299_v2  ;;  %s315_s8 = scvt.s32.f32 %s314_s24  ;;  %s999_s28 = sld [smem:[#allocation3 + $0x17]] }
  0x95   :  { %s311_s13 = scalar_lea.vmem [#allocation4], %s1147_s9  ;;  %s1001_s29 = sld [smem:[#allocation3 + $0x18]] }
  0x96   :  { %305 = vst [vmem:[#allocation7 + $0x14] sm:$0x1] %v304_v4  ;;  %v312_v5 = vld [vmem:[%s311_s13] sm:$0x1]  ;;  %v316_v6 = vstv %s315_s8  ;;  %s1003_s30 = sld [smem:[#allocation3 + $0x19]]  ;;  %s1005_s12 = sld [smem:[#allocation3 + $0x1a]] }
  0x97   :  { %v317_v7 = vmul.f32 %v316_v6, %v312_v5  ;;  %s1007_s1 = sld [smem:[#allocation3 + $0x1b]]  ;;  %s1009_s4 = sld [smem:[#allocation3 + $0x1c]] }
  0x98   :  { %s1011_s5 = sld [smem:[#allocation3 + $0x1d]]  ;;  %s1013_s9 = sld [smem:[#allocation3 + $0x1e]] }
  0x99   :  { %318 = vst [vmem:[#allocation7 + $0x15] sm:$0x1] %v317_v7  ;;  %s1015_s6 = sld [smem:[#allocation3 + $0x1f]]  ;;  %p320_p9 = scmp.gt.s32.totalorder %s645_s25, 0 }
  0x9a   :  { %p646_p10 = scmp.lt.s32.totalorder %s645_s25, 511  ;;  %p326_p11 = scmp.ne.s32.totalorder %s645_s25, 0 }
  0x9b   :  { %p333_p12 = scmp.gt.s32.totalorder %s999_s28, 0  ;;  %s1149_s25 = smov (!%p320_p9, %s645_s25), 0 }
  0x9c   :  { %s327_s7 = scalar_select %p326_p11, 1, 0 }
  0x9d   :  { %s1151_s25 = smov (!%p646_p10, %s1149_s25), 511  ;;  %p652_p13 = scmp.lt.s32.totalorder %s999_s28, 511 }
  0x9e   :  { %s328_s14 = scvt.s32.f32 %s327_s7  ;;  %p339_p0 = scmp.ne.s32.totalorder %s999_s28, 0 }
  0x9f   :  { %s324_s15 = scalar_lea.vmem [#allocation4], %s1151_s25  ;;  %s1153_s28 = smov (!%p333_p12, %s999_s28), 0 }
  0xa0   :  { %v325_v8 = vld [vmem:[%s324_s15] sm:$0x1]  ;;  %v329_v9 = vstv %s328_s14  ;;  %s340_s18 = scalar_select %p339_p0, 1, 0 }
  0xa1   :  { %v330_v10 = vmul.f32 %v329_v9, %v325_v8  ;;  %s1155_s28 = smov (!%p652_p13, %s1153_s28), 511  ;;  %p346_p1 = scmp.gt.s32.totalorder %s1001_s29, 0 }
  0xa2   :  { %s341_s19 = scvt.s32.f32 %s340_s18  ;;  %p658_p2 = scmp.lt.s32.totalorder %s1001_s29, 511 }
  0xa3   :  { %331 = vst [vmem:[#allocation7 + $0x16] sm:$0x1] %v330_v10  ;;  %s337_s0 = scalar_lea.vmem [#allocation4], %s1155_s28  ;;  %p352_p3 = scmp.ne.s32.totalorder %s1001_s29, 0 }
  0xa4   :  { %v338_v11 = vld [vmem:[%s337_s0] sm:$0x1]  ;;  %v342_v12 = vstv %s341_s19  ;;  %s347_s16 = scalar_select %p346_p1, %s1001_s29, 0 }
  0xa5   :  { %v343_v13 = vmul.f32 %v342_v12, %v338_v11  ;;  %p359_p4 = scmp.gt.s32.totalorder %s1003_s30, 0  ;;  %p664_p5 = scmp.lt.s32.totalorder %s1003_s30, 511 }
  0xa6   :  { %s1157_s16 = smov (!%p658_p2, %s347_s16), 511  ;;  %p365_p6 = scmp.ne.s32.totalorder %s1003_s30, 0 }
  0xa7   :  { %344 = vst [vmem:[#allocation7 + $0x17] sm:$0x1] %v343_v13  ;;  %s353_s20 = scalar_select %p352_p3, 1, 0 }
  0xa8   :  { %s350_s17 = scalar_lea.vmem [#allocation4], %s1157_s16  ;;  %s1159_s30 = smov (!%p359_p4, %s1003_s30), 0 }
  0xa9   :  { %v351_v14 = vld [vmem:[%s350_s17] sm:$0x1]  ;;  %s354_s21 = scvt.s32.f32 %s353_s20  ;;  %s1161_s30 = smov (!%p664_p5, %s1159_s30), 511 }
  0xaa   :  { %s366_s10 = scalar_select %p365_p6, 1, 0 }
  0xab   :  { %v355_v15 = vstv %s354_s21  ;;  %p372_p7 = scmp.gt.s32.totalorder %s1005_s12, 0  ;;  %p670_p8 = scmp.lt.s32.totalorder %s1005_s12, 511 }
  0xac   :  { %v356_v16 = vmul.f32 %v355_v15, %v351_v14  ;;  %s367_s23 = scvt.s32.f32 %s366_s10  ;;  %s363_s24 = scalar_lea.vmem [#allocation4], %s1161_s30 }
  0xad   :  { %v364_v19 = vld [vmem:[%s363_s24] sm:$0x1]  ;;  %s373_s8 = scalar_select %p372_p7, %s1005_s12, 0 }
  0xae   :  { %357 = vst [vmem:[#allocation7 + $0x18] sm:$0x1] %v356_v16  ;;  %v451_v18 = vld [vmem:[#allocation7 + $0x10] sm:$0xff]  ;;  %v368_v20 = vstv %s367_s23  ;;  %p378_p9 = scmp.ne.s32.totalorder %s1005_s12, 0  ;;  %p385_p10 = scmp.gt.s32.totalorder %s1007_s1, 0 }
  0xaf   :  { %v459_v21 = vmul.f32 %v455_v17, %v451_v18  ;;  %v369_v22 = vmul.f32 %v368_v20, %v364_v19  ;;  %s1163_s8 = smov (!%p670_p8, %s373_s8), 511  ;;  %p676_p11 = scmp.lt.s32.totalorder %s1007_s1, 511 }
  0xb0   :  { %s379_s25 = scalar_select %p378_p9, 1, 0 }
  0xb1   :  { %463 = vst [vmem:[#allocation7 + $0x10] sm:$0xff] %v459_v21  ;;  %370 = vst [vmem:[#allocation7 + $0x19] sm:$0x1] %v369_v22  ;;  %s376_s28 = scalar_lea.vmem [#allocation4], %s1163_s8  ;;  %p391_p12 = scmp.ne.s32.totalorder %s1007_s1, 0 }
  0xb2   :  { %v377_v23 = vld [vmem:[%s376_s28] sm:$0x1]  ;;  %s380_s13 = scvt.s32.f32 %s379_s25  ;;  %s1165_s1 = smov (!%p385_p10, %s1007_s1), 0 }
  0xb3   :  { %s392_s29 = scalar_select %p391_p12, 1, 0 }
  0xb4   :  { %v381_v24 = vstv %s380_s13  ;;  %s1167_s1 = smov (!%p676_p11, %s1165_s1), 511  ;;  %p398_p13 = scmp.gt.s32.totalorder %s1009_s4, 0 }
  0xb5   :  { %v382_v25 = vmul.f32 %v381_v24, %v377_v23  ;;  %s393_s30 = scvt.s32.f32 %s392_s29  ;;  %p682_p0 = scmp.lt.s32.totalorder %s1009_s4, 511 }
  0xb6   :  { %s389_s12 = scalar_lea.vmem [#allocation4], %s1167_s1  ;;  %p404_p1 = scmp.ne.s32.totalorder %s1009_s4, 0 }
  0xb7   :  { %383 = vst [vmem:[#allocation7 + $0x1a] sm:$0x1] %v382_v25  ;;  %v390_v26 = vld [vmem:[%s389_s12] sm:$0x1]  ;;  %v394_v27 = vstv %s393_s30  ;;  %s399_s7 = scalar_select %p398_p13, %s1009_s4, 0 }
  0xb8   :  { %v395_v28 = vmul.f32 %v394_v27, %v390_v26  ;;  %p411_p2 = scmp.gt.s32.totalorder %s1011_s5, 0  ;;  %p688_p3 = scmp.lt.s32.totalorder %s1011_s5, 511 }
  0xb9   :  { %s1169_s7 = smov (!%p682_p0, %s399_s7), 511  ;;  %p417_p4 = scmp.ne.s32.totalorder %s1011_s5, 0 }
  0xba   :  { %396 = vst [vmem:[#allocation7 + $0x1b] sm:$0x1] %v395_v28  ;;  %s405_s14 = scalar_select %p404_p1, 1, 0 }
  0xbb   :  { %s402_s15 = scalar_lea.vmem [#allocation4], %s1169_s7  ;;  %s1171_s5 = smov (!%p411_p2, %s1011_s5), 0 }
  0xbc   :  { %v403_v29 = vld [vmem:[%s402_s15] sm:$0x1]  ;;  %s406_s18 = scvt.s32.f32 %s405_s14  ;;  %s1173_s5 = smov (!%p688_p3, %s1171_s5), 511 }
  0xbd   :  { %s418_s1 = scalar_select %p417_p4, 1, 0 }
  0xbe   :  { %v407_v30 = vstv %s406_s18  ;;  %p424_p5 = scmp.gt.s32.totalorder %s1013_s9, 0  ;;  %p694_p6 = scmp.lt.s32.totalorder %s1013_s9, 511 }
  0xbf   :  { %v408_v31 = vmul.f32 %v407_v30, %v403_v29  ;;  %s419_s4 = scvt.s32.f32 %s418_s1  ;;  %s415_s19 = scalar_lea.vmem [#allocation4], %s1173_s5 }
  0xc0   :  { %v416_v32 = vld [vmem:[%s415_s19] sm:$0x1]  ;;  %s425_s0 = scalar_select %p424_p5, %s1013_s9, 0 }
  0xc1   :  { %409 = vst [vmem:[#allocation7 + $0x1c] sm:$0x1] %v408_v31  ;;  %v420_v33 = vstv %s419_s4  ;;  %p430_p7 = scmp.ne.s32.totalorder %s1013_s9, 0  ;;  %p437_p8 = scmp.gt.s32.totalorder %s1015_s6, 0 }
  0xc2   :  { %v421_v34 = vmul.f32 %v420_v33, %v416_v32  ;;  %s1175_s0 = smov (!%p694_p6, %s425_s0), 511  ;;  %p700_p9 = scmp.lt.s32.totalorder %s1015_s6, 511 }
  0xc3   :  { %s431_s16 = scalar_select %p430_p7, 1, 0 }
  0xc4   :  { %422 = vst [vmem:[#allocation7 + $0x1d] sm:$0x1] %v421_v34  ;;  %s428_s20 = scalar_lea.vmem [#allocation4], %s1175_s0  ;;  %p443_p10 = scmp.ne.s32.totalorder %s1015_s6, 0 }
  0xc5   :  { %v429_v35 = vld [vmem:[%s428_s20] sm:$0x1]  ;;  %s432_s17 = scvt.s32.f32 %s431_s16  ;;  %s1177_s6 = smov (!%p437_p8, %s1015_s6), 0 }
  0xc6   :  { %s444_s21 = scalar_select %p443_p10, 1, 0 }
  0xc7   :  { %v433_v36 = vstv %s432_s17  ;;  %s1179_s6 = smov (!%p700_p9, %s1177_s6), 511  ;;  %s840_s22 = smov [#allocation7]  }
  0xc8   :  { %v434_v37 = vmul.f32 %v433_v36, %v429_v35  ;;  %s445_s5 = scvt.s32.f32 %s444_s21  ;;  %s441_s10 = scalar_lea.vmem [#allocation4], %s1179_s6 }
  0xc9   :  { %v442_v38 = vld [vmem:[%s441_s10] sm:$0x1]  ;;  %s470_s23 = sshll.u32 %s840_s22, 4  ;;  %s471_s23 = int_to_ptr.vmem [resolvable:$true] %s470_s23 }
  0xca   :  { %435 = vst [vmem:[#allocation7 + $0x1e] sm:$0x1] %v434_v37  ;;  %v446_v39 = vstv %s445_s5  ;;  %s808_s24 = scalar_lea.vmem %s471_s23, 512  ;;  %p813_p12 = scmp.lt.s32.totalorder %s471_s23, %s471_s23 }
  0xcb   :  { %v447_v40 = vmul.f32 %v446_v39, %v442_v38  ;;  %p809_p11 = scmp.ne.s32.totalorder %s471_s23, %s808_s24  ;;  %p814_p13 = scmp.lt.s32.totalorder %s808_s24, %s808_s24 }
  0xcd   :  { %448 = vst [vmem:[#allocation7 + $0x1f] sm:$0x1] %v447_v40  ;;  %p815_p0 = por %p814_p13, %p813_p12 }
  0xcf   :  { %p816_p1 = pnand %p815_p0, %p809_p11 }
  0xd4   :  { %v452_v42 = vld [vmem:[#allocation7 + $0x18] sm:$0xff] }
  0xd5   :  { %v460_v43 = vmul.f32 %v456_v41, %v452_v42 }
  0xd7   :  { %464 = vst [vmem:[#allocation7 + $0x18] sm:$0xff] %v460_v43 }
  0xd8   :  { %819 = shalt.err (!%p816_p1)
}
  0xd9   :  { %s820_s25 = scalar_lea.hbm %s1077_s3, 512 }
  0xda   :  { %p821_p2 = scmp.ne.s32.totalorder %s1077_s3, %s820_s25  ;;  %p824_p3 = scmp.lt.u32.totalorder %s820_s25, %s1077_s3 }
  0xdc   :  { %p826_p4 = pnand %p824_p3, %p821_p2 }
  0xde   :  { %829 = shalt.err (!%p826_p4)
}
  0xdf   :  { %476 = dma.vmem_to_hbm [thread:$0]  %s471_s23, 512, %s1077_s3, [#allocation6], %s838_s26, %s838_s26, %s839_s27  }
  0xe0   :  { %834 = dma.done.wait [#allocation6], 512  }
  0xe1   :  { %835 = vsyncadd [#allocation6], 4294966784 }
  0xe2   :  { %480 = vsyncpa [#allocation5], 1 }
  0xe3   :  { %481 = vsyncpa [#allocation6], 1 }

</bundles_post_ra>
